<compile_context>
chip_gen: v7x
topology: tpu7x:2x2x1
jax: 0.10.0
libtpu: 0.0.40
codegen_flags: <defaults>
</compile_context>

<pallas_src>
import jax
import jax.numpy as jnp
from jax.experimental import pallas as pl
from jax.experimental.pallas import tpu as pltpu

_LANE = 128
_SUBLANE = 8


def _round_up(x, m):
    return (x + m - 1) // m * m


def _vmem_capacity_bytes():
    """Physical VMEM of the current TPU generation (conservative fallback)."""
    try:
        return int(pltpu.get_tpu_info().vmem_capacity_bytes)
    except Exception:
        return 64 * 1024 * 1024  # assume the smallest (v7x) if query fails


# --------------------------------------------------------------------------- #
# Kernel
# --------------------------------------------------------------------------- #
def mlp_kernel(x_ref, w1_ref, b1_ref, w2_ref, b2_ref, w3_ref, b3_ref, o_ref):
    # x_ref / w*_ref are bf16; accumulate in f32 on the MXU.
    # ---- layer 1: Linear + ReLU (dropout = identity at inference) ----
    h1 = jnp.dot(x_ref[...], w1_ref[...], preferred_element_type=jnp.float32)
    h1 = jnp.maximum(h1 + b1_ref[...], 0.0)                    # f32 bias/ReLU

    # ---- layer 2: Linear + ReLU ----
    h2 = jnp.dot(h1.astype(jnp.bfloat16), w2_ref[...],
                 preferred_element_type=jnp.float32)
    h2 = jnp.maximum(h2 + b2_ref[...], 0.0)

    # ---- layer 3: Linear + Softmax over the feature axis (torch dim=1) ----
    logits = jnp.dot(h2.astype(jnp.bfloat16), w3_ref[...],
                     preferred_element_type=jnp.float32)
    logits = logits + b3_ref[...]                              # padded cols = -1e30
    m = jnp.max(logits, axis=-1, keepdims=True)
    e = jnp.exp(logits - m)
    denom = jnp.sum(e, axis=-1, keepdims=True)
    # exact (non-approx) reciprocal still runs on the EUP slot -> nearly free
    o_ref[...] = (e * pl.reciprocal(denom, approx=False)).astype(o_ref.dtype)


# --------------------------------------------------------------------------- #
# Tiling / VMEM sizing
# --------------------------------------------------------------------------- #
def _choose_tile_b(B, d_in_p, h1_p, h2_p, d_out_p, out_itemsize, weight_buf,
                   budget_bytes):
    """Pick a batch tile (multiple of 8) whose VMEM footprint fits the budget."""

    def est(tb):
        # weights counted at their true buffer multiplicity (1x with Buffered(1))
        weights = weight_buf * 2 * (d_in_p * h1_p + h1_p * h2_p + h2_p * d_out_p)  # bf16
        biases = weight_buf * 4 * _SUBLANE * (h1_p + h2_p + d_out_p)               # f32, (8,*) padded
        act_in = 2 * 2 * tb * d_in_p                                               # bf16, double-buffered
        act_out = 2 * out_itemsize * tb * d_out_p                                  # double-buffered
        interm = 4 * tb * (h1_p + h2_p + d_out_p)                                  # live f32 temporaries
        return weights + biases + act_in + act_out + interm

    # Generation-aware cap: big tiles amortise the ~0.35us/step overhead on
    # 128 MiB-VMEM parts (v5e/v6e); keep it tighter on 64 MiB v7x.
    cap = 1024 if budget_bytes >= (80 << 20) else 256
    # Keep >= 2 grid steps when the batch allows it so the "parallel" batch
    # axis can actually shard across v7x's two TensorCores.
    if B > _SUBLANE:
        cap = min(cap, max(_SUBLANE, _round_up((B + 1) // 2, _SUBLANE)))

    tile_b = max(_SUBLANE, min(cap, _round_up(B, _SUBLANE)))
    while tile_b > _SUBLANE and est(tile_b) > budget_bytes:
        tile_b = _round_up(tile_b // 2, _SUBLANE)
    return tile_b, est(tile_b)


# --------------------------------------------------------------------------- #
# Parameter preparation (run ONCE, not per forward)
# --------------------------------------------------------------------------- #
def prepare_params(params):
    """Pad every feature dim to a multiple of 128 and cast weights to bf16.

    Done once so net_forward never pays per-call padding/cast HBM traffic.
    Padded hidden columns get zero weights/biases (ReLU(0)=0 -> no
    contribution); padded OUTPUT columns get a -1e30 bias so exp() kills them
    in the softmax.
    """
    w1, b1, w2, b2, w3, b3 = (params[k] for k in ("w1", "b1", "w2", "b2", "w3", "b3"))
    d_in, h1 = w1.shape
    h2 = w2.shape[1]
    d_out = w3.shape[1]
    d_in_p, h1_p, h2_p, d_out_p = (_round_up(d, _LANE) for d in (d_in, h1, h2, d_out))

    bf16 = jnp.bfloat16

    def pad_w(w, rows, cols):
        return jnp.pad(w.astype(bf16),
                       ((0, rows - w.shape[0]), (0, cols - w.shape[1])))

    def pad_b(b, cols, fill=0.0):
        b2d = jnp.asarray(b, jnp.float32).reshape(1, -1)
        return jnp.pad(b2d, ((0, 0), (0, cols - b2d.shape[1])),
                       constant_values=fill)

    return {
        "w1": pad_w(w1, d_in_p, h1_p), "b1": pad_b(b1, h1_p),
        "w2": pad_w(w2, h1_p, h2_p),   "b2": pad_b(b2, h2_p),
        "w3": pad_w(w3, h2_p, d_out_p), "b3": pad_b(b3, d_out_p, fill=-1e30),
        "dims": (d_in, h1, h2, d_out),
        "padded_dims": (d_in_p, h1_p, h2_p, d_out_p),
    }


# --------------------------------------------------------------------------- #
# Forward pass
# --------------------------------------------------------------------------- #
def net_forward(x, prepped, out_dtype=jnp.float32):
    """x: (B, d_in) float32.  prepped: output of prepare_params.

    out_dtype=jnp.bfloat16 halves the writeback (biggest share of HBM traffic
    for this memory-bound shape) if downstream accepts bf16 probabilities.
    """
    d_in, h1, h2, d_out = prepped["dims"]
    d_in_p, h1_p, h2_p, d_out_p = prepped["padded_dims"]
    B = x.shape[0]
    assert x.shape[1] == d_in, "input feature dim mismatch"

    vmem_cap = _vmem_capacity_bytes()
    # ~96 MiB usable on 128 MiB parts (v5e/v6e), ~40 MiB on 64 MiB v7x.
    budget = int(vmem_cap * 0.75) if vmem_cap >= (96 << 20) else int(vmem_cap * 0.625)

    out_itemsize = jnp.dtype(out_dtype).itemsize
    can_single_buffer = hasattr(pl, "Buffered")
    tile_b, vmem_est = _choose_tile_b(
        B, d_in_p, h1_p, h2_p, d_out_p, out_itemsize,
        weight_buf=1 if can_single_buffer else 2, budget_bytes=budget)
    B_p = _round_up(B, tile_b)
    n_tiles = B_p // tile_b

    # ---- lane-dense activation padding (single pad op, skipped when aligned) ----
    bf16 = jnp.bfloat16
    if B_p == B and d_in_p == d_in and x.dtype == bf16:
        xp = x
    else:
        xp = jnp.pad(x.astype(bf16), ((0, B_p - B), (0, d_in_p - d_in)))

    flops = 2 * B_p * (d_in_p * h1_p + h1_p * h2_p + h2_p * d_out_p)
    bytes_accessed = (xp.size * 2
                      + 2 * (d_in_p * h1_p + h1_p * h2_p + h2_p * d_out_p)
                      + 4 * (h1_p + h2_p + d_out_p)
                      + B_p * d_out_p * out_itemsize)
    cost = pl.CostEstimate(flops=flops, transcendentals=B_p * d_out_p,
                           bytes_accessed=int(bytes_accessed))

    vmem_limit = int(min(max(2 * vmem_est, 32 << 20), int(0.9 * vmem_cap)))

    def run(single_buffer):
        def resident(a):
            idx = lambda i: (0,) * a.ndim
            if single_buffer:
                # constant index_map -> data never changes; one buffer suffices
                return pl.BlockSpec(a.shape, idx, pipeline_mode=pl.Buffered(1))
            return pl.BlockSpec(a.shape, idx)

        return pl.pallas_call(
            mlp_kernel,
            out_shape=jax.ShapeDtypeStruct((B_p, d_out_p), out_dtype),
            grid=(n_tiles,),
            in_specs=[
                pl.BlockSpec((tile_b, d_in_p), lambda i: (i, 0)),  # batch-tiled acts
                resident(prepped["w1"]), resident(prepped["b1"]),
                resident(prepped["w2"]), resident(prepped["b2"]),
                resident(prepped["w3"]), resident(prepped["b3"]),
            ],
            out_specs=pl.BlockSpec((tile_b, d_out_p), lambda i: (i, 0)),
            compiler_params=pltpu.CompilerParams(
                dimension_semantics=("parallel",),
                vmem_limit_bytes=vmem_limit,
            ),
            cost_estimate=cost,
        )(xp, prepped["w1"], prepped["b1"], prepped["w2"], prepped["b2"],
          prepped["w3"], prepped["b3"])

    if can_single_buffer:
        try:
            out_p = run(True)
        except Exception:
            # older/stricter Pallas versions: fall back to default double-buffering
            out_p = run(False)
    else:
        out_p = run(False)

    return out_p[:B, :d_out]


# --------------------------------------------------------------------------- #
# Synthetic params + demo
# --------------------------------------------------------------------------- #
def init_params(key, d_in, h1, h2, d_out):
    """Deterministic synthetic parameters (PyTorch Linear-like uniform init)."""
    ks = jax.random.split(key, 6)

    def lin(kw, kb, fan_in, fan_out):
        bound = 1.0 / jnp.sqrt(fan_in)
        w = jax.random.uniform(kw, (fan_in, fan_out), jnp.float32, -bound, bound)
        b = jax.random.uniform(kb, (1, fan_out), jnp.float32, -bound, bound)
        return w, b

    w1, b1 = lin(ks[0], ks[1], d_in, h1)
    w2, b2 = lin(ks[2], ks[3], h1, h2)
    w3, b3 = lin(ks[4], ks[5], h2, d_out)
    return {"w1": w1, "b1": b1, "w2": w2, "b2": b2, "w3": w3, "b3": b3}


if __name__ == "__main__":
    key = jax.random.PRNGKey(0)
    kx, kp = jax.random.split(key)

    # small shapes consistent with Net(input, hidden_1, hidden_2, out_put)
    B, D_IN, H1, H2, D_OUT = 8, 32, 64, 64, 16

    x = jax.random.normal(kx, (B, D_IN), jnp.float32)
    params = init_params(kp, D_IN, H1, H2, D_OUT)

    # Pad/cast weights ONCE (not per forward call).
    prepped = jax.block_until_ready(prepare_params(params))

    out = net_forward(x, prepped)
    out = jax.block_until_ready(out)

    # sanity check against a pure-JAX f32 reference (eval-mode dropout);
    # tolerance loosened because the kernel matmuls run in bf16.
    h1 = jnp.maximum(x @ params["w1"] + params["b1"], 0.0)
    h2 = jnp.maximum(h1 @ params["w2"] + params["b2"], 0.0)
    ref = jax.nn.softmax(h2 @ params["w3"] + params["b3"], axis=1)
    assert out.shape == (B, D_OUT)
    assert jnp.allclose(out, ref, atol=2e-2), "mismatch vs reference"
    assert jnp.allclose(jnp.sum(out, axis=1), 1.0, atol=5e-3)

    print("KERNEL_OK")
</pallas_src>

<mosaic_0001>
module attributes {stable_mosaic.version = 11 : i64} {
  func.func @mlp_kernel(%arg0: i32, %arg1: memref<8x128xbf16, #tpu.memory_space<vmem>>, %arg2: memref<128x128xbf16, #tpu.memory_space<vmem>>, %arg3: memref<1x128xf32, #tpu.memory_space<vmem>>, %arg4: memref<128x128xbf16, #tpu.memory_space<vmem>>, %arg5: memref<1x128xf32, #tpu.memory_space<vmem>>, %arg6: memref<128x128xbf16, #tpu.memory_space<vmem>>, %arg7: memref<1x128xf32, #tpu.memory_space<vmem>>, %arg8: memref<8x128xf32, #tpu.memory_space<vmem>>) attributes {dimension_semantics = [#tpu.dimension_semantics<parallel>], iteration_bounds = array<i64: 1>, scalar_prefetch = 0 : i64, scratch_operands = 0 : i64, tpu.core_type = #tpu.core_type<tc>, window_params = [{transform_indices = @transform_0, window_bounds = array<i64: 8, 128>}, {pipeline_mode = #tpu.pipeline_mode<synchronous>, transform_indices = @transform_1, window_bounds = array<i64: 128, 128>}, {pipeline_mode = #tpu.pipeline_mode<synchronous>, transform_indices = @transform_2, window_bounds = array<i64: 1, 128>}, {pipeline_mode = #tpu.pipeline_mode<synchronous>, transform_indices = @transform_3, window_bounds = array<i64: 128, 128>}, {pipeline_mode = #tpu.pipeline_mode<synchronous>, transform_indices = @transform_4, window_bounds = array<i64: 1, 128>}, {pipeline_mode = #tpu.pipeline_mode<synchronous>, transform_indices = @transform_5, window_bounds = array<i64: 128, 128>}, {pipeline_mode = #tpu.pipeline_mode<synchronous>, transform_indices = @transform_6, window_bounds = array<i64: 1, 128>}, {transform_indices = @transform_7, window_bounds = array<i64: 8, 128>}]} {
    %c0 = arith.constant 0 : index
    %c0_0 = arith.constant 0 : index
    %0 = vector.load %arg1[%c0, %c0_0] : memref<8x128xbf16, #tpu.memory_space<vmem>>, vector<8x128xbf16>
    %c0_1 = arith.constant 0 : index
    %c0_2 = arith.constant 0 : index
    %1 = vector.load %arg2[%c0_1, %c0_2] : memref<128x128xbf16, #tpu.memory_space<vmem>>, vector<128x128xbf16>
    %cst = arith.constant dense<0.000000e+00> : vector<8x128xf32>
    %2 = tpu.matmul %0, %1, %cst {dimension_numbers = #tpu.dot_dimension_numbers<[1], [0], [0], [1], [0, 0, 1, 1], [], []>} : vector<8x128xbf16>, vector<128x128xbf16>, vector<8x128xf32> -> vector<8x128xf32>
    %c0_3 = arith.constant 0 : index
    %c0_4 = arith.constant 0 : index
    %3 = vector.load %arg3[%c0_3, %c0_4] : memref<1x128xf32, #tpu.memory_space<vmem>>, vector<1x128xf32>
    %4 = vector.broadcast %3 : vector<1x128xf32> to vector<8x128xf32>
    %5 = arith.addf %2, %4 : vector<8x128xf32>
    %cst_5 = arith.constant 0.000000e+00 : f32
    %6 = vector.broadcast %cst_5 : f32 to vector<8x128xf32>
    %7 = arith.maximumf %5, %6 : vector<8x128xf32>
    %8 = arith.truncf %7 : vector<8x128xf32> to vector<8x128xbf16>
    %c0_6 = arith.constant 0 : index
    %c0_7 = arith.constant 0 : index
    %9 = vector.load %arg4[%c0_6, %c0_7] : memref<128x128xbf16, #tpu.memory_space<vmem>>, vector<128x128xbf16>
    %cst_8 = arith.constant dense<0.000000e+00> : vector<8x128xf32>
    %10 = tpu.matmul %8, %9, %cst_8 {dimension_numbers = #tpu.dot_dimension_numbers<[1], [0], [0], [1], [0, 0, 1, 1], [], []>} : vector<8x128xbf16>, vector<128x128xbf16>, vector<8x128xf32> -> vector<8x128xf32>
    %c0_9 = arith.constant 0 : index
    %c0_10 = arith.constant 0 : index
    %11 = vector.load %arg5[%c0_9, %c0_10] : memref<1x128xf32, #tpu.memory_space<vmem>>, vector<1x128xf32>
    %12 = vector.broadcast %11 : vector<1x128xf32> to vector<8x128xf32>
    %13 = arith.addf %10, %12 : vector<8x128xf32>
    %cst_11 = arith.constant 0.000000e+00 : f32
    %14 = vector.broadcast %cst_11 : f32 to vector<8x128xf32>
    %15 = arith.maximumf %13, %14 : vector<8x128xf32>
    %16 = arith.truncf %15 : vector<8x128xf32> to vector<8x128xbf16>
    %c0_12 = arith.constant 0 : index
    %c0_13 = arith.constant 0 : index
    %17 = vector.load %arg6[%c0_12, %c0_13] : memref<128x128xbf16, #tpu.memory_space<vmem>>, vector<128x128xbf16>
    %cst_14 = arith.constant dense<0.000000e+00> : vector<8x128xf32>
    %18 = tpu.matmul %16, %17, %cst_14 {dimension_numbers = #tpu.dot_dimension_numbers<[1], [0], [0], [1], [0, 0, 1, 1], [], []>} : vector<8x128xbf16>, vector<128x128xbf16>, vector<8x128xf32> -> vector<8x128xf32>
    %c0_15 = arith.constant 0 : index
    %c0_16 = arith.constant 0 : index
    %19 = vector.load %arg7[%c0_15, %c0_16] : memref<1x128xf32, #tpu.memory_space<vmem>>, vector<1x128xf32>
    %20 = vector.broadcast %19 : vector<1x128xf32> to vector<8x128xf32>
    %21 = arith.addf %18, %20 : vector<8x128xf32>
    %cst_17 = arith.constant dense<0xFF800000> : vector<8xf32>
    %22 = vector.multi_reduction <maximumf>, %21, %cst_17 [1] : vector<8x128xf32> to vector<8xf32>
    %23 = vector.shape_cast %22 : vector<8xf32> to vector<8x1xf32>
    %24 = vector.broadcast %23 : vector<8x1xf32> to vector<8x128xf32>
    %25 = arith.subf %21, %24 : vector<8x128xf32>
    %26 = math.exp %25 : vector<8x128xf32>
    %cst_18 = arith.constant dense<0.000000e+00> : vector<8xf32>
    %27 = vector.multi_reduction <add>, %26, %cst_18 [1] : vector<8x128xf32> to vector<8xf32>
    %28 = vector.shape_cast %27 : vector<8xf32> to vector<8x1xf32>
    %29 = tpu.reciprocal %28 : vector<8x1xf32> -> vector<8x1xf32>
    %30 = vector.broadcast %29 : vector<8x1xf32> to vector<8x128xf32>
    %31 = arith.mulf %26, %30 : vector<8x128xf32>
    %c0_19 = arith.constant 0 : index
    %c0_20 = arith.constant 0 : index
    %32 = vector.load %arg8[%c0_19, %c0_20] : memref<8x128xf32, #tpu.memory_space<vmem>>, vector<8x128xf32>
    tpu.vector_store %arg8[%c0_19, %c0_20], %31 {strides = array<i32>} : memref<8x128xf32, #tpu.memory_space<vmem>>, vector<8x128xf32>,
    return
  }
  func.func @transform_0(%arg0: i32) -> (i32, i32) {
    %c0_i32 = arith.constant 0 : i32
    %c0_i32_0 = arith.constant 0 : i32
    return %arg0, %c0_i32 : i32, i32
  }
  func.func @transform_1(%arg0: i32) -> (i32, i32) {
    %c0_i32 = arith.constant 0 : i32
    %c0_i32_0 = arith.constant 0 : i32
    %c0_i32_1 = arith.constant 0 : i32
    return %c0_i32, %c0_i32_0 : i32, i32
  }
  func.func @transform_2(%arg0: i32) -> (i32, i32) {
    %c0_i32 = arith.constant 0 : i32
    %c0_i32_0 = arith.constant 0 : i32
    %c0_i32_1 = arith.constant 0 : i32
    return %c0_i32, %c0_i32_0 : i32, i32
  }
  func.func @transform_3(%arg0: i32) -> (i32, i32) {
    %c0_i32 = arith.constant 0 : i32
    %c0_i32_0 = arith.constant 0 : i32
    %c0_i32_1 = arith.constant 0 : i32
    return %c0_i32, %c0_i32_0 : i32, i32
  }
  func.func @transform_4(%arg0: i32) -> (i32, i32) {
    %c0_i32 = arith.constant 0 : i32
    %c0_i32_0 = arith.constant 0 : i32
    %c0_i32_1 = arith.constant 0 : i32
    return %c0_i32, %c0_i32_0 : i32, i32
  }
  func.func @transform_5(%arg0: i32) -> (i32, i32) {
    %c0_i32 = arith.constant 0 : i32
    %c0_i32_0 = arith.constant 0 : i32
    %c0_i32_1 = arith.constant 0 : i32
    return %c0_i32, %c0_i32_0 : i32, i32
  }
  func.func @transform_6(%arg0: i32) -> (i32, i32) {
    %c0_i32 = arith.constant 0 : i32
    %c0_i32_0 = arith.constant 0 : i32
    %c0_i32_1 = arith.constant 0 : i32
    return %c0_i32, %c0_i32_0 : i32, i32
  }
  func.func @transform_7(%arg0: i32) -> (i32, i32) {
    %c0_i32 = arith.constant 0 : i32
    %c0_i32_0 = arith.constant 0 : i32
    return %arg0, %c0_i32 : i32, i32
  }
}

module attributes {stable_mosaic.version = 11 : i64} {
  func.func @mlp_kernel(%arg0: i32, %arg1: memref<8x128xbf16, #tpu.memory_space<vmem>>, %arg2: memref<128x128xbf16, #tpu.memory_space<vmem>>, %arg3: memref<1x128xf32, #tpu.memory_space<vmem>>, %arg4: memref<128x128xbf16, #tpu.memory_space<vmem>>, %arg5: memref<1x128xf32, #tpu.memory_space<vmem>>, %arg6: memref<128x128xbf16, #tpu.memory_space<vmem>>, %arg7: memref<1x128xf32, #tpu.memory_space<vmem>>, %arg8: memref<8x128xf32, #tpu.memory_space<vmem>>) attributes {dimension_semantics = [#tpu.dimension_semantics<parallel>], iteration_bounds = array<i64: 1>, scalar_prefetch = 0 : i64, scratch_operands = 0 : i64, tpu.core_type = #tpu.core_type<tc>, window_params = [{transform_indices = @transform_0, window_bounds = array<i64: 8, 128>}, {pipeline_mode = #tpu.pipeline_mode<synchronous>, transform_indices = @transform_1, window_bounds = array<i64: 128, 128>}, {pipeline_mode = #tpu.pipeline_mode<synchronous>, transform_indices = @transform_2, window_bounds = array<i64: 1, 128>}, {pipeline_mode = #tpu.pipeline_mode<synchronous>, transform_indices = @transform_3, window_bounds = array<i64: 128, 128>}, {pipeline_mode = #tpu.pipeline_mode<synchronous>, transform_indices = @transform_4, window_bounds = array<i64: 1, 128>}, {pipeline_mode = #tpu.pipeline_mode<synchronous>, transform_indices = @transform_5, window_bounds = array<i64: 128, 128>}, {pipeline_mode = #tpu.pipeline_mode<synchronous>, transform_indices = @transform_6, window_bounds = array<i64: 1, 128>}, {transform_indices = @transform_7, window_bounds = array<i64: 8, 128>}]} {
    %c0 = arith.constant 0 : index
    %c0_0 = arith.constant 0 : index
    %0 = vector.load %arg1[%c0, %c0_0] : memref<8x128xbf16, #tpu.memory_space<vmem>>, vector<8x128xbf16>
    %c0_1 = arith.constant 0 : index
    %c0_2 = arith.constant 0 : index
    %1 = vector.load %arg2[%c0_1, %c0_2] : memref<128x128xbf16, #tpu.memory_space<vmem>>, vector<128x128xbf16>
    %cst = arith.constant dense<0.000000e+00> : vector<8x128xf32>
    %2 = tpu.matmul %0, %1, %cst {dimension_numbers = #tpu.dot_dimension_numbers<[1], [0], [0], [1], [0, 0, 1, 1], [], []>} : vector<8x128xbf16>, vector<128x128xbf16>, vector<8x128xf32> -> vector<8x128xf32>
    %c0_3 = arith.constant 0 : index
    %c0_4 = arith.constant 0 : index
    %3 = vector.load %arg3[%c0_3, %c0_4] : memref<1x128xf32, #tpu.memory_space<vmem>>, vector<1x128xf32>
    %4 = vector.broadcast %3 : vector<1x128xf32> to vector<8x128xf32>
    %5 = arith.addf %2, %4 : vector<8x128xf32>
    %cst_5 = arith.constant 0.000000e+00 : f32
    %6 = vector.broadcast %cst_5 : f32 to vector<8x128xf32>
    %7 = arith.maximumf %5, %6 : vector<8x128xf32>
    %8 = arith.truncf %7 : vector<8x128xf32> to vector<8x128xbf16>
    %c0_6 = arith.constant 0 : index
    %c0_7 = arith.constant 0 : index
    %9 = vector.load %arg4[%c0_6, %c0_7] : memref<128x128xbf16, #tpu.memory_space<vmem>>, vector<128x128xbf16>
    %cst_8 = arith.constant dense<0.000000e+00> : vector<8x128xf32>
    %10 = tpu.matmul %8, %9, %cst_8 {dimension_numbers = #tpu.dot_dimension_numbers<[1], [0], [0], [1], [0, 0, 1, 1], [], []>} : vector<8x128xbf16>, vector<128x128xbf16>, vector<8x128xf32> -> vector<8x128xf32>
    %c0_9 = arith.constant 0 : index
    %c0_10 = arith.constant 0 : index
    %11 = vector.load %arg5[%c0_9, %c0_10] : memref<1x128xf32, #tpu.memory_space<vmem>>, vector<1x128xf32>
    %12 = vector.broadcast %11 : vector<1x128xf32> to vector<8x128xf32>
    %13 = arith.addf %10, %12 : vector<8x128xf32>
    %cst_11 = arith.constant 0.000000e+00 : f32
    %14 = vector.broadcast %cst_11 : f32 to vector<8x128xf32>
    %15 = arith.maximumf %13, %14 : vector<8x128xf32>
    %16 = arith.truncf %15 : vector<8x128xf32> to vector<8x128xbf16>
    %c0_12 = arith.constant 0 : index
    %c0_13 = arith.constant 0 : index
    %17 = vector.load %arg6[%c0_12, %c0_13] : memref<128x128xbf16, #tpu.memory_space<vmem>>, vector<128x128xbf16>
    %cst_14 = arith.constant dense<0.000000e+00> : vector<8x128xf32>
    %18 = tpu.matmul %16, %17, %cst_14 {dimension_numbers = #tpu.dot_dimension_numbers<[1], [0], [0], [1], [0, 0, 1, 1], [], []>} : vector<8x128xbf16>, vector<128x128xbf16>, vector<8x128xf32> -> vector<8x128xf32>
    %c0_15 = arith.constant 0 : index
    %c0_16 = arith.constant 0 : index
    %19 = vector.load %arg7[%c0_15, %c0_16] : memref<1x128xf32, #tpu.memory_space<vmem>>, vector<1x128xf32>
    %20 = vector.broadcast %19 : vector<1x128xf32> to vector<8x128xf32>
    %21 = arith.addf %18, %20 : vector<8x128xf32>
    %cst_17 = arith.constant dense<0xFF800000> : vector<8xf32>
    %22 = vector.multi_reduction <maximumf>, %21, %cst_17 [1] : vector<8x128xf32> to vector<8xf32>
    %23 = vector.shape_cast %22 : vector<8xf32> to vector<8x1xf32>
    %24 = vector.broadcast %23 : vector<8x1xf32> to vector<8x128xf32>
    %25 = arith.subf %21, %24 : vector<8x128xf32>
    %26 = math.exp %25 : vector<8x128xf32>
    %cst_18 = arith.constant dense<0.000000e+00> : vector<8xf32>
    %27 = vector.multi_reduction <add>, %26, %cst_18 [1] : vector<8x128xf32> to vector<8xf32>
    %28 = vector.shape_cast %27 : vector<8xf32> to vector<8x1xf32>
    %29 = tpu.reciprocal %28 : vector<8x1xf32> -> vector<8x1xf32>
    %30 = vector.broadcast %29 : vector<8x1xf32> to vector<8x128xf32>
    %31 = arith.mulf %26, %30 : vector<8x128xf32>
    %c0_19 = arith.constant 0 : index
    %c0_20 = arith.constant 0 : index
    %32 = vector.load %arg8[%c0_19, %c0_20] : memref<8x128xf32, #tpu.memory_space<vmem>>, vector<8x128xf32>
    tpu.vector_store %arg8[%c0_19, %c0_20], %31 {strides = array<i32>} : memref<8x128xf32, #tpu.memory_space<vmem>>, vector<8x128xf32>,
    return
  }
  func.func @transform_0(%arg0: i32) -> (i32, i32) {
    %c0_i32 = arith.constant 0 : i32
    %c0_i32_0 = arith.constant 0 : i32
    return %arg0, %c0_i32 : i32, i32
  }
  func.func @transform_1(%arg0: i32) -> (i32, i32) {
    %c0_i32 = arith.constant 0 : i32
    %c0_i32_0 = arith.constant 0 : i32
    %c0_i32_1 = arith.constant 0 : i32
    return %c0_i32, %c0_i32_0 : i32, i32
  }
  func.func @transform_2(%arg0: i32) -> (i32, i32) {
    %c0_i32 = arith.constant 0 : i32
    %c0_i32_0 = arith.constant 0 : i32
    %c0_i32_1 = arith.constant 0 : i32
    return %c0_i32, %c0_i32_0 : i32, i32
  }
  func.func @transform_3(%arg0: i32) -> (i32, i32) {
    %c0_i32 = arith.constant 0 : i32
    %c0_i32_0 = arith.constant 0 : i32
    %c0_i32_1 = arith.constant 0 : i32
    return %c0_i32, %c0_i32_0 : i32, i32
  }
  func.func @transform_4(%arg0: i32) -> (i32, i32) {
    %c0_i32 = arith.constant 0 : i32
    %c0_i32_0 = arith.constant 0 : i32
    %c0_i32_1 = arith.constant 0 : i32
    return %c0_i32, %c0_i32_0 : i32, i32
  }
  func.func @transform_5(%arg0: i32) -> (i32, i32) {
    %c0_i32 = arith.constant 0 : i32
    %c0_i32_0 = arith.constant 0 : i32
    %c0_i32_1 = arith.constant 0 : i32
    return %c0_i32, %c0_i32_0 : i32, i32
  }
  func.func @transform_6(%arg0: i32) -> (i32, i32) {
    %c0_i32 = arith.constant 0 : i32
    %c0_i32_0 = arith.constant 0 : i32
    %c0_i32_1 = arith.constant 0 : i32
    return %c0_i32, %c0_i32_0 : i32, i32
  }
  func.func @transform_7(%arg0: i32) -> (i32, i32) {
    %c0_i32 = arith.constant 0 : i32
    %c0_i32_0 = arith.constant 0 : i32
    return %arg0, %c0_i32 : i32, i32
  }
}

</mosaic_0001>

<bundles_post_ra>
// kernel: tpu_custom_call.1
= control target key start
LH: loop header
LB: loop body
LE: loop exit
PB: predicated region body
PF: predicated region fallthrough
CT: control target
= control target key end

     0   :  { %12 = vsyncpa [#allocation3], 0  ;;  %s872_s0 = inlined_call_operand.hbm [shape: bf16[8,128], index: 0, kind: input, shape index: {}]   ;;  %s873_s1 = inlined_call_operand.hbm [shape: bf16[128,128], index: 1, kind: input, shape index: {}]   ;;  %s874_s2 = inlined_call_operand.vmem [shape: f32[1,128], index: 2, kind: input, shape index: {}]   ;;  %s875_s3 = inlined_call_operand.hbm [shape: bf16[128,128], index: 3, kind: input, shape index: {}]   ;;  %s876_s4 = inlined_call_operand.vmem [shape: f32[1,128], index: 4, kind: input, shape index: {}]   ;;  %s877_s5 = inlined_call_operand.hbm [shape: bf16[128,128], index: 5, kind: input, shape index: {}]   ;;  %s878_s6 = inlined_call_operand.vmem [shape: f32[1,128], index: 6, kind: input, shape index: {}]   ;;  %s879_s7 = inlined_call_operand.hbm [shape: f32[8,128], index: 7, kind: output, shape index: {}]  }
   0x1   :  { %13 = vsyncpa [#allocation6], 0 }
   0x2   :  { %14 = vsyncpa [#allocation9], 0 }
   0x3   :  { %15 = vsyncpa [#allocation4], 0  ;;  %s715_s24 = smov [#allocation5]   ;;  %s597_s28 = scalar_lea.hbm %s873_s1, 1024 }
   0x4   :  { %s31_s25 = sshll.u32 %s715_s24, 4  ;;  %p598_p0 = scmp.ne.s32.totalorder %s873_s1, %s597_s28  ;;  %s32_s25 = int_to_ptr.vmem [resolvable:$true] %s31_s25 }
   0x5   :  { %p601_p1 = scmp.lt.u32.totalorder %s597_s28, %s873_s1 }
   0x7   :  { %p603_p2 = pnand %p601_p1, %p598_p0 }
   0x9   :  { %606 = shalt.err (!%p603_p2)
}
   0xa   :  { %s607_s10 = scalar_lea.vmem %s32_s25, 1024  ;;  %p612_p4 = scmp.lt.s32.totalorder %s32_s25, %s32_s25 }
   0xb   :  { %p608_p3 = scmp.ne.s32.totalorder %s32_s25, %s607_s10  ;;  %p613_p5 = scmp.lt.s32.totalorder %s607_s10, %s607_s10 }
   0xd   :  { %p614_p6 = por %p613_p5, %p612_p4 }
   0xf   :  { %p615_p7 = pnand %p614_p6, %p608_p3 }
  0x11   :  { %618 = shalt.err (!%p615_p7)
}
  0x12   :  { %s716_s11 = smov 64   ;;  %s717_s12 = smov 4  }
  0x13   :  { %37 = dma.hbm_to_vmem [thread:$0]  %s873_s1, 1024, %s32_s25, [#allocation6], %s716_s11, %s716_s11, %s717_s12  }
  0x14   :  { %s718_s15 = smov [#allocation2]   ;;  %s719_s17 = smov [#allocation7]  }
  0x15   :  { %s22_s16 = sshll.u32 %s718_s15, 4  ;;  %s45_s18 = sshll.u32 %s719_s17, 4  ;;  %s23_s16 = int_to_ptr.vmem [resolvable:$true] %s22_s16  ;;  %s46_s18 = int_to_ptr.vmem [resolvable:$true] %s45_s18 }
  0x16   :  { %s619_s21 = scalar_lea.hbm %s872_s0, 64 }
  0x17   :  { %p620_p8 = scmp.ne.s32.totalorder %s872_s0, %s619_s21  ;;  %p623_p9 = scmp.lt.u32.totalorder %s619_s21, %s872_s0 }
  0x19   :  { %p625_p10 = pnand %p623_p9, %p620_p8 }
  0x1b   :  { %628 = shalt.err (!%p625_p10)
}
  0x1c   :  { %s629_s1 = scalar_lea.vmem %s23_s16, 64  ;;  %p634_p12 = scmp.lt.s32.totalorder %s23_s16, %s23_s16 }
  0x1d   :  { %p630_p11 = scmp.ne.s32.totalorder %s23_s16, %s629_s1  ;;  %p635_p13 = scmp.lt.s32.totalorder %s629_s1, %s629_s1 }
  0x1f   :  { %p636_p0 = por %p635_p13, %p634_p12 }
  0x21   :  { %p637_p1 = pnand %p636_p0, %p630_p11 }
  0x23   :  { %640 = shalt.err (!%p637_p1)
}
  0x24   :  { %25 = dma.hbm_to_vmem [thread:$0]  %s872_s0, 64, %s23_s16, [#allocation3]  }
  0x25   :  { %s641_s30 = scalar_lea.hbm %s875_s3, 1024 }
  0x26   :  { %p642_p2 = scmp.ne.s32.totalorder %s875_s3, %s641_s30  ;;  %p645_p3 = scmp.lt.u32.totalorder %s641_s30, %s875_s3 }
  0x28   :  { %p647_p4 = pnand %p645_p3, %p642_p2 }
  0x2a   :  { %650 = shalt.err (!%p647_p4)
}
  0x2b   :  { %s651_s14 = scalar_lea.vmem %s46_s18, 1024  ;;  %p656_p6 = scmp.lt.s32.totalorder %s46_s18, %s46_s18 }
  0x2c   :  { %p652_p5 = scmp.ne.s32.totalorder %s46_s18, %s651_s14  ;;  %p657_p7 = scmp.lt.s32.totalorder %s651_s14, %s651_s14 }
  0x2e   :  { %p658_p8 = por %p657_p7, %p656_p6 }
  0x30   :  { %p659_p9 = pnand %p658_p8, %p652_p5 }
  0x32   :  { %662 = shalt.err (!%p659_p9)
}
  0x33   :  { %51 = dma.hbm_to_vmem [thread:$0]  %s875_s3, 1024, %s46_s18, [#allocation6], %s716_s11, %s716_s11, %s717_s12  }
  0x34   :  { %s720_s16 = smov [#allocation8]   ;;  %s663_s21 = scalar_lea.hbm %s877_s5, 1024 }
  0x35   :  { %s59_s17 = sshll.u32 %s720_s16, 4  ;;  %p664_p10 = scmp.ne.s32.totalorder %s877_s5, %s663_s21  ;;  %s60_s17 = int_to_ptr.vmem [resolvable:$true] %s59_s17 }
  0x36   :  { %p667_p11 = scmp.lt.u32.totalorder %s663_s21, %s877_s5 }
  0x38   :  { %p669_p12 = pnand %p667_p11, %p664_p10 }
  0x3a   :  { %672 = shalt.err (!%p669_p12)
}
  0x3b   :  { %s673_s1 = scalar_lea.vmem %s60_s17, 1024  ;;  %p678_p0 = scmp.lt.s32.totalorder %s60_s17, %s60_s17 }
  0x3c   :  { %p674_p13 = scmp.ne.s32.totalorder %s60_s17, %s673_s1  ;;  %p679_p1 = scmp.lt.s32.totalorder %s673_s1, %s673_s1 }
  0x3e   :  { %p680_p2 = por %p679_p1, %p678_p0 }
  0x40   :  { %p681_p3 = pnand %p680_p2, %p674_p13 }
  0x42   :  { %684 = shalt.err (!%p681_p3)
}
  0x43   :  { %65 = dma.hbm_to_vmem [thread:$0]  %s877_s5, 1024, %s60_s17, [#allocation9], %s716_s11, %s716_s11, %s717_s12  }
  0x44   :  { %707 = dma.done.wait [#allocation3], 64  }
  0x45   :  { %708 = vsyncadd [#allocation3], 4294967232 }
  0x46   :  { %709 = dma.done.wait [#allocation6], 2048  }
  0x47   :  { %710 = vsyncadd [#allocation6], 4294965248 }
  0x48   :  { %711 = dma.done.wait [#allocation9], 1024  }
  0x49   :  { %712 = vsyncadd [#allocation9], 4294966272  ;;  %v721_v0 = vmov 0.0   ;;  %vm722_vm0 = vmmov 0   ;;  %v569_v1 = vld [vmem:[#allocation5] sm:$0xff]   ;;  %v570_v2 = vld [vmem:[#allocation5 + $0x8] sm:$0xff]  }
  0x4a   :  { %500 = vmatprep.subr.bf16.mxu0 %v721_v0  ;;  %516 = vmatprep.mubr.msk.bf16.mxu0 %vm722_vm0, %v721_v0  ;;  %v571_v3 = vld [vmem:[#allocation5 + $0x10] sm:$0xff]   ;;  %v577_v4 = vld [vmem:[#allocation7] sm:$0xff]   ;;  %v572_v5 = vld [vmem:[#allocation5 + $0x18] sm:$0xff]  }
  0x4b   :  { %520 = vmatprep.subr.bf16.mxu1 %v721_v0  ;;  %536 = vmatprep.mubr.msk.bf16.mxu1 %vm722_vm0, %v721_v0  ;;  %v578_v6 = vld [vmem:[#allocation7 + $0x8] sm:$0xff]   ;;  %v573_v7 = vld [vmem:[#allocation5 + $0x20] sm:$0xff]   ;;  %v579_v8 = vld [vmem:[#allocation7 + $0x10] sm:$0xff]  }
  0x4c   :  { %501 = vmatpush3.bf16.msra.mxu0 %v569_v1  ;;  %521 = vmatpush3.bf16.msra.mxu1 %v577_v4  ;;  %v574_v9 = vld [vmem:[#allocation5 + $0x28] sm:$0xff]   ;;  %v580_v10 = vld [vmem:[#allocation7 + $0x18] sm:$0xff]   ;;  %v575_v11 = vld [vmem:[#allocation5 + $0x30] sm:$0xff]  }
  0x4d   :  { %502 = vmatprep.subr.bf16.mxu0 %v721_v0  ;;  %522 = vmatprep.subr.bf16.mxu1 %v721_v0  ;;  %v581_v12 = vld [vmem:[#allocation7 + $0x20] sm:$0xff]   ;;  %v576_v13 = vld [vmem:[#allocation5 + $0x38] sm:$0xff]   ;;  %v582_v14 = vld [vmem:[#allocation7 + $0x28] sm:$0xff]  }
  0x4e   :  { %v81_v15 = vld [vmem:[#allocation2] sm:$0xf]  ;;  %v583_v16 = vld [vmem:[#allocation7 + $0x30] sm:$0xff]   ;;  %v585_v18 = vld [vmem:[#allocation8] sm:$0xff]  }
  0x4f   :  { %v584_v17 = vld [vmem:[#allocation7 + $0x38] sm:$0xff]   ;;  %v586_v19 = vld [vmem:[#allocation8 + $0x8] sm:$0xff]   ;;  %v587_v20 = vld [vmem:[#allocation8 + $0x10] sm:$0xff]  }
  0x50   :  { %503 = vmatpush3.bf16.msra.mxu0 %v570_v2  ;;  %523 = vmatpush3.bf16.msra.mxu1 %v578_v6  ;;  %v588_v21 = vld [vmem:[#allocation8 + $0x18] sm:$0xff]   ;;  %v589_v22 = vld [vmem:[#allocation8 + $0x20] sm:$0xff]   ;;  %v590_v23 = vld [vmem:[#allocation8 + $0x28] sm:$0xff]  }
  0x51   :  { %504 = vmatprep.subr.bf16.mxu0 %v721_v0  ;;  %524 = vmatprep.subr.bf16.mxu1 %v721_v0  ;;  %v446_v24 = vld [vmem:[%s874_s2] ss:$0 sm:$0xff]  ;;  %v591_v32 = vld [vmem:[#allocation8 + $0x30] sm:$0xff]  }
  0x52   :  { %v592_v33 = vld [vmem:[#allocation8 + $0x38] sm:$0xff]  }
  0x53   :  { %v455_v34 = vld [vmem:[%s876_s4] ss:$0 sm:$0xff]  ;;  %s723_s4 = smov [#allocation10]  }
  0x54   :  { %505 = vmatpush3.bf16.msra.mxu0 %v571_v3  ;;  %525 = vmatpush3.bf16.msra.mxu1 %v579_v8  ;;  %v464_v42 = vld [vmem:[%s878_s6] ss:$0 sm:$0xff]  ;;  %s435_s28 = sshll.u32 %s723_s4, 4  ;;  %s436_s28 = int_to_ptr.vmem [resolvable:$true] %s435_s28 }
  0x55   :  { %506 = vmatprep.subr.bf16.mxu0 %v721_v0  ;;  %526 = vmatprep.subr.bf16.mxu1 %v721_v0  ;;  %s685_s6 = scalar_lea.vmem %s436_s28, 128  ;;  %p690_p5 = scmp.lt.s32.totalorder %s436_s28, %s436_s28 }
  0x56   :  { %p686_p4 = scmp.ne.s32.totalorder %s436_s28, %s685_s6  ;;  %p691_p6 = scmp.lt.s32.totalorder %s685_s6, %s685_s6 }
  0x58   :  { %507 = vmatpush3.bf16.msra.mxu0 %v572_v5  ;;  %527 = vmatpush3.bf16.msra.mxu1 %v580_v10  ;;  %p692_p7 = por %p691_p6, %p690_p5 }
  0x59   :  { %508 = vmatprep.subr.bf16.mxu0 %v721_v0  ;;  %528 = vmatprep.subr.bf16.mxu1 %v721_v0 }
  0x5a   :  { %p693_p8 = pnand %p692_p7, %p686_p4 }
  0x5c   :  { %509 = vmatpush3.bf16.msra.mxu0 %v573_v7  ;;  %529 = vmatpush3.bf16.msra.mxu1 %v581_v12 }
  0x5d   :  { %510 = vmatprep.subr.bf16.mxu0 %v721_v0  ;;  %530 = vmatprep.subr.bf16.mxu1 %v721_v0 }
  0x60   :  { %511 = vmatpush3.bf16.msra.mxu0 %v574_v9  ;;  %531 = vmatpush3.bf16.msra.mxu1 %v582_v14 }
  0x61   :  { %512 = vmatprep.subr.bf16.mxu0 %v721_v0  ;;  %532 = vmatprep.subr.bf16.mxu1 %v721_v0 }
  0x64   :  { %513 = vmatpush3.bf16.msra.mxu0 %v575_v11  ;;  %533 = vmatpush3.bf16.msra.mxu1 %v583_v16 }
  0x65   :  { %514 = vmatprep.subr.bf16.mxu0 %v721_v0  ;;  %534 = vmatprep.subr.bf16.mxu1 %v721_v0 }
  0x68   :  { %515 = vmatpush3.bf16.msra.mxu0 %v576_v13  ;;  %535 = vmatpush3.bf16.msra.mxu1 %v584_v17 }
  0x69   :  { %540 = vmatprep.subr.bf16.mxu0 %v721_v0 }
  0x6b   :  { %517 = vmatmul.mubr.bf16.vlgmr.msra.gmra.mrb[0].mxu0 %v81_v15 }
  0x6c   :  { %556 = vmatprep.mubr.msk.bf16.mxu0 %vm722_vm0, %v721_v0  ;;  %541 = vmatpush3.bf16.msra.mxu0 %v585_v18 }
  0x6d   :  { %542 = vmatprep.subr.bf16.mxu0 %v721_v0 }
  0x70   :  { %543 = vmatpush3.bf16.msra.mxu0 %v586_v19 }
  0x71   :  { %544 = vmatprep.subr.bf16.mxu0 %v721_v0 }
  0x74   :  { %545 = vmatpush3.bf16.msra.mxu0 %v587_v20 }
  0x75   :  { %546 = vmatprep.subr.bf16.mxu0 %v721_v0 }
  0x78   :  { %547 = vmatpush3.bf16.msra.mxu0 %v588_v21 }
  0x79   :  { %548 = vmatprep.subr.bf16.mxu0 %v721_v0 }
  0x7c   :  { %549 = vmatpush3.bf16.msra.mxu0 %v589_v22 }
  0x7d   :  { %550 = vmatprep.subr.bf16.mxu0 %v721_v0 }
  0x80   :  { %551 = vmatpush3.bf16.msra.mxu0 %v590_v23 }
  0x81   :  { %552 = vmatprep.subr.bf16.mxu0 %v721_v0 }
  0x84   :  { %553 = vmatpush3.bf16.msra.mxu0 %v591_v32 }
  0x85   :  { %554 = vmatprep.subr.bf16.mxu0 %v721_v0 }
  0x88   :  { %555 = vmatpush3.bf16.msra.mxu0 %v592_v33 }
 0x13e   :  { %v187_v25 = vpop.f32.mrb[0].mxu0 }
 0x13f   :  { %v188_v26 = vadd.f32 %v446_v24, %v187_v25  ;;  %v518_v27 = vpop.f32.mrb[1].mxu0 }
 0x140   :  { %v190_v28 = vpop.f32.mrb[2].mxu0 }
 0x141   :  { %v193_v29 = vmax.f32 %v188_v26, 0.0  ;;  %v519_v30 = vpop.f32.mrb[3].mxu0 }
 0x143   :  { %v194_v31 = vpack.c.bf16 %v193_v29, %v193_v29 }
 0x145   :  { %537 = vmatmul.mubr.bf16.vlgmr.msra.gmra.mrb[0].mxu1 %v194_v31 }
 0x218   :  { %v300_v35 = vpop.f32.mrb[0].mxu1 }
 0x219   :  { %v301_v36 = vadd.f32 %v455_v34, %v300_v35  ;;  %v538_v37 = vpop.f32.mrb[1].mxu1 }
 0x21a   :  { %v303_v38 = vpop.f32.mrb[2].mxu1 }
 0x21b   :  { %v306_v39 = vmax.f32 %v301_v36, 0.0  ;;  %v539_v40 = vpop.f32.mrb[3].mxu1 }
 0x21d   :  { %v307_v41 = vpack.c.bf16 %v306_v39, %v306_v39 }
 0x21f   :  { %557 = vmatmul.mubr.bf16.vlgmr.msra.gmra.mrb[4].mxu0 %v307_v41 }
 0x2f2   :  { %v413_v43 = vpop.f32.mrb[4].mxu0 }
 0x2f3   :  { %v414_v44 = vadd.f32 %v464_v42, %v413_v43  ;;  %v558_v45 = vpop.f32.mrb[5].mxu0 }
 0x2f4   :  { %v416_v46 = vpop.f32.mrb[6].mxu0 }
 0x2f5   :  { %419 = vmax.xlane.f32.xlu0 %v414_v44  ;;  %v559_v47 = vpop.f32.mrb[7].mxu0 }
 0x382   :  { %v420_v48 = vpop.xlane.xlu0 %419 }
 0x383   :  { %v421_v49 = vsub.f32 %v414_v44, %v420_v48 }
 0x385   :  { %v422_v50 = vmul.f32 1.442695, %v421_v49 }
 0x387   :  { %593 = vpow2.f32 %v422_v50 }
 0x391   :  { %v594_v51 = vpop.eup %593 }
 0x392   :  { %424 = vadd.xlane.f32.xlu0 %v594_v51 }
 0x41f   :  { %v425_v52 = vpop.xlane.xlu0 %424 }
 0x420   :  { %595 = vrcp.f32 %v425_v52 }
 0x42a   :  { %v596_v53 = vpop.eup %595 }
 0x42b   :  { %v427_v54 = vmul.f32 %v596_v53, %v594_v51 }
 0x42d   :  { %428 = vst [vmem:[#allocation10] sm:$0xff] %v427_v54 }
 0x42e   :  { %696 = shalt.err (!%p693_p8)
}
 0x42f   :  { %s697_s8 = scalar_lea.hbm %s879_s7, 128 }
 0x430   :  { %p698_p9 = scmp.ne.s32.totalorder %s879_s7, %s697_s8  ;;  %p701_p10 = scmp.lt.u32.totalorder %s697_s8, %s879_s7 }
 0x432   :  { %p703_p11 = pnand %p701_p10, %p698_p9 }
 0x434   :  { %706 = shalt.err (!%p703_p11)
}
 0x435   :  { %438 = dma.vmem_to_hbm [thread:$0]  %s436_s28, 128, %s879_s7, [#allocation4]  }
 0x436   :  { %713 = dma.done.wait [#allocation4], 128  }
 0x437   :  { %714 = vsyncadd [#allocation4], 4294967168 }
 0x438   :  { %442 = vsyncpa [#allocation3], 1 }
 0x439   :  { %443 = vsyncpa [#allocation6], 1 }
 0x43a   :  { %444 = vsyncpa [#allocation9], 1 }
 0x43b   :  { %445 = vsyncpa [#allocation4], 1 }

// kernel: tpu_custom_call.1
= control target key start
LH: loop header
LB: loop body
LE: loop exit
PB: predicated region body
PF: predicated region fallthrough
CT: control target
= control target key end

     0   :  { %12 = vsyncpa [#allocation3], 0  ;;  %s872_s0 = inlined_call_operand.hbm [shape: bf16[8,128], index: 0, kind: input, shape index: {}]   ;;  %s873_s1 = inlined_call_operand.hbm [shape: bf16[128,128], index: 1, kind: input, shape index: {}]   ;;  %s874_s2 = inlined_call_operand.vmem [shape: f32[1,128], index: 2, kind: input, shape index: {}]   ;;  %s875_s3 = inlined_call_operand.hbm [shape: bf16[128,128], index: 3, kind: input, shape index: {}]   ;;  %s876_s4 = inlined_call_operand.vmem [shape: f32[1,128], index: 4, kind: input, shape index: {}]   ;;  %s877_s5 = inlined_call_operand.hbm [shape: bf16[128,128], index: 5, kind: input, shape index: {}]   ;;  %s878_s6 = inlined_call_operand.vmem [shape: f32[1,128], index: 6, kind: input, shape index: {}]   ;;  %s879_s7 = inlined_call_operand.hbm [shape: f32[8,128], index: 7, kind: output, shape index: {}]  }
   0x1   :  { %13 = vsyncpa [#allocation6], 0 }
   0x2   :  { %14 = vsyncpa [#allocation9], 0 }
   0x3   :  { %15 = vsyncpa [#allocation4], 0  ;;  %s715_s24 = smov [#allocation5]   ;;  %s597_s28 = scalar_lea.hbm %s873_s1, 1024 }
   0x4   :  { %s31_s25 = sshll.u32 %s715_s24, 4  ;;  %p598_p0 = scmp.ne.s32.totalorder %s873_s1, %s597_s28  ;;  %s32_s25 = int_to_ptr.vmem [resolvable:$true] %s31_s25 }
   0x5   :  { %p601_p1 = scmp.lt.u32.totalorder %s597_s28, %s873_s1 }
   0x7   :  { %p603_p2 = pnand %p601_p1, %p598_p0 }
   0x9   :  { %606 = shalt.err (!%p603_p2)
}
   0xa   :  { %s607_s10 = scalar_lea.vmem %s32_s25, 1024  ;;  %p612_p4 = scmp.lt.s32.totalorder %s32_s25, %s32_s25 }
   0xb   :  { %p608_p3 = scmp.ne.s32.totalorder %s32_s25, %s607_s10  ;;  %p613_p5 = scmp.lt.s32.totalorder %s607_s10, %s607_s10 }
   0xd   :  { %p614_p6 = por %p613_p5, %p612_p4 }
   0xf   :  { %p615_p7 = pnand %p614_p6, %p608_p3 }
  0x11   :  { %618 = shalt.err (!%p615_p7)
}
  0x12   :  { %s716_s11 = smov 64   ;;  %s717_s12 = smov 4  }
  0x13   :  { %37 = dma.hbm_to_vmem [thread:$0]  %s873_s1, 1024, %s32_s25, [#allocation6], %s716_s11, %s716_s11, %s717_s12  }
  0x14   :  { %s718_s15 = smov [#allocation2]   ;;  %s719_s17 = smov [#allocation7]  }
  0x15   :  { %s22_s16 = sshll.u32 %s718_s15, 4  ;;  %s45_s18 = sshll.u32 %s719_s17, 4  ;;  %s23_s16 = int_to_ptr.vmem [resolvable:$true] %s22_s16  ;;  %s46_s18 = int_to_ptr.vmem [resolvable:$true] %s45_s18 }
  0x16   :  { %s619_s21 = scalar_lea.hbm %s872_s0, 64 }
  0x17   :  { %p620_p8 = scmp.ne.s32.totalorder %s872_s0, %s619_s21  ;;  %p623_p9 = scmp.lt.u32.totalorder %s619_s21, %s872_s0 }
  0x19   :  { %p625_p10 = pnand %p623_p9, %p620_p8 }
  0x1b   :  { %628 = shalt.err (!%p625_p10)
}
  0x1c   :  { %s629_s1 = scalar_lea.vmem %s23_s16, 64  ;;  %p634_p12 = scmp.lt.s32.totalorder %s23_s16, %s23_s16 }
  0x1d   :  { %p630_p11 = scmp.ne.s32.totalorder %s23_s16, %s629_s1  ;;  %p635_p13 = scmp.lt.s32.totalorder %s629_s1, %s629_s1 }
  0x1f   :  { %p636_p0 = por %p635_p13, %p634_p12 }
  0x21   :  { %p637_p1 = pnand %p636_p0, %p630_p11 }
  0x23   :  { %640 = shalt.err (!%p637_p1)
}
  0x24   :  { %25 = dma.hbm_to_vmem [thread:$0]  %s872_s0, 64, %s23_s16, [#allocation3]  }
  0x25   :  { %s641_s30 = scalar_lea.hbm %s875_s3, 1024 }
  0x26   :  { %p642_p2 = scmp.ne.s32.totalorder %s875_s3, %s641_s30  ;;  %p645_p3 = scmp.lt.u32.totalorder %s641_s30, %s875_s3 }
  0x28   :  { %p647_p4 = pnand %p645_p3, %p642_p2 }
  0x2a   :  { %650 = shalt.err (!%p647_p4)
}
  0x2b   :  { %s651_s14 = scalar_lea.vmem %s46_s18, 1024  ;;  %p656_p6 = scmp.lt.s32.totalorder %s46_s18, %s46_s18 }
  0x2c   :  { %p652_p5 = scmp.ne.s32.totalorder %s46_s18, %s651_s14  ;;  %p657_p7 = scmp.lt.s32.totalorder %s651_s14, %s651_s14 }
  0x2e   :  { %p658_p8 = por %p657_p7, %p656_p6 }
  0x30   :  { %p659_p9 = pnand %p658_p8, %p652_p5 }
  0x32   :  { %662 = shalt.err (!%p659_p9)
}
  0x33   :  { %51 = dma.hbm_to_vmem [thread:$0]  %s875_s3, 1024, %s46_s18, [#allocation6], %s716_s11, %s716_s11, %s717_s12  }
  0x34   :  { %s720_s16 = smov [#allocation8]   ;;  %s663_s21 = scalar_lea.hbm %s877_s5, 1024 }
  0x35   :  { %s59_s17 = sshll.u32 %s720_s16, 4  ;;  %p664_p10 = scmp.ne.s32.totalorder %s877_s5, %s663_s21  ;;  %s60_s17 = int_to_ptr.vmem [resolvable:$true] %s59_s17 }
  0x36   :  { %p667_p11 = scmp.lt.u32.totalorder %s663_s21, %s877_s5 }
  0x38   :  { %p669_p12 = pnand %p667_p11, %p664_p10 }
  0x3a   :  { %672 = shalt.err (!%p669_p12)
}
  0x3b   :  { %s673_s1 = scalar_lea.vmem %s60_s17, 1024  ;;  %p678_p0 = scmp.lt.s32.totalorder %s60_s17, %s60_s17 }
  0x3c   :  { %p674_p13 = scmp.ne.s32.totalorder %s60_s17, %s673_s1  ;;  %p679_p1 = scmp.lt.s32.totalorder %s673_s1, %s673_s1 }
  0x3e   :  { %p680_p2 = por %p679_p1, %p678_p0 }
  0x40   :  { %p681_p3 = pnand %p680_p2, %p674_p13 }
  0x42   :  { %684 = shalt.err (!%p681_p3)
}
  0x43   :  { %65 = dma.hbm_to_vmem [thread:$0]  %s877_s5, 1024, %s60_s17, [#allocation9], %s716_s11, %s716_s11, %s717_s12  }
  0x44   :  { %707 = dma.done.wait [#allocation3], 64  }
  0x45   :  { %708 = vsyncadd [#allocation3], 4294967232 }
  0x46   :  { %709 = dma.done.wait [#allocation6], 2048  }
  0x47   :  { %710 = vsyncadd [#allocation6], 4294965248 }
  0x48   :  { %711 = dma.done.wait [#allocation9], 1024  }
  0x49   :  { %712 = vsyncadd [#allocation9], 4294966272  ;;  %v721_v0 = vmov 0.0   ;;  %vm722_vm0 = vmmov 0   ;;  %v569_v1 = vld [vmem:[#allocation5] sm:$0xff]   ;;  %v570_v2 = vld [vmem:[#allocation5 + $0x8] sm:$0xff]  }
  0x4a   :  { %500 = vmatprep.subr.bf16.mxu0 %v721_v0  ;;  %516 = vmatprep.mubr.msk.bf16.mxu0 %vm722_vm0, %v721_v0  ;;  %v571_v3 = vld [vmem:[#allocation5 + $0x10] sm:$0xff]   ;;  %v577_v4 = vld [vmem:[#allocation7] sm:$0xff]   ;;  %v572_v5 = vld [vmem:[#allocation5 + $0x18] sm:$0xff]  }
  0x4b   :  { %520 = vmatprep.subr.bf16.mxu1 %v721_v0  ;;  %536 = vmatprep.mubr.msk.bf16.mxu1 %vm722_vm0, %v721_v0  ;;  %v578_v6 = vld [vmem:[#allocation7 + $0x8] sm:$0xff]   ;;  %v573_v7 = vld [vmem:[#allocation5 + $0x20] sm:$0xff]   ;;  %v579_v8 = vld [vmem:[#allocation7 + $0x10] sm:$0xff]  }
  0x4c   :  { %501 = vmatpush3.bf16.msra.mxu0 %v569_v1  ;;  %521 = vmatpush3.bf16.msra.mxu1 %v577_v4  ;;  %v574_v9 = vld [vmem:[#allocation5 + $0x28] sm:$0xff]   ;;  %v580_v10 = vld [vmem:[#allocation7 + $0x18] sm:$0xff]   ;;  %v575_v11 = vld [vmem:[#allocation5 + $0x30] sm:$0xff]  }
  0x4d   :  { %502 = vmatprep.subr.bf16.mxu0 %v721_v0  ;;  %522 = vmatprep.subr.bf16.mxu1 %v721_v0  ;;  %v581_v12 = vld [vmem:[#allocation7 + $0x20] sm:$0xff]   ;;  %v576_v13 = vld [vmem:[#allocation5 + $0x38] sm:$0xff]   ;;  %v582_v14 = vld [vmem:[#allocation7 + $0x28] sm:$0xff]  }
  0x4e   :  { %v81_v15 = vld [vmem:[#allocation2] sm:$0xf]  ;;  %v583_v16 = vld [vmem:[#allocation7 + $0x30] sm:$0xff]   ;;  %v585_v18 = vld [vmem:[#allocation8] sm:$0xff]  }
  0x4f   :  { %v584_v17 = vld [vmem:[#allocation7 + $0x38] sm:$0xff]   ;;  %v586_v19 = vld [vmem:[#allocation8 + $0x8] sm:$0xff]   ;;  %v587_v20 = vld [vmem:[#allocation8 + $0x10] sm:$0xff]  }
  0x50   :  { %503 = vmatpush3.bf16.msra.mxu0 %v570_v2  ;;  %523 = vmatpush3.bf16.msra.mxu1 %v578_v6  ;;  %v588_v21 = vld [vmem:[#allocation8 + $0x18] sm:$0xff]   ;;  %v589_v22 = vld [vmem:[#allocation8 + $0x20] sm:$0xff]   ;;  %v590_v23 = vld [vmem:[#allocation8 + $0x28] sm:$0xff]  }
  0x51   :  { %504 = vmatprep.subr.bf16.mxu0 %v721_v0  ;;  %524 = vmatprep.subr.bf16.mxu1 %v721_v0  ;;  %v446_v24 = vld [vmem:[%s874_s2] ss:$0 sm:$0xff]  ;;  %v591_v32 = vld [vmem:[#allocation8 + $0x30] sm:$0xff]  }
  0x52   :  { %v592_v33 = vld [vmem:[#allocation8 + $0x38] sm:$0xff]  }
  0x53   :  { %v455_v34 = vld [vmem:[%s876_s4] ss:$0 sm:$0xff]  ;;  %s723_s4 = smov [#allocation10]  }
  0x54   :  { %505 = vmatpush3.bf16.msra.mxu0 %v571_v3  ;;  %525 = vmatpush3.bf16.msra.mxu1 %v579_v8  ;;  %v464_v42 = vld [vmem:[%s878_s6] ss:$0 sm:$0xff]  ;;  %s435_s28 = sshll.u32 %s723_s4, 4  ;;  %s436_s28 = int_to_ptr.vmem [resolvable:$true] %s435_s28 }
  0x55   :  { %506 = vmatprep.subr.bf16.mxu0 %v721_v0  ;;  %526 = vmatprep.subr.bf16.mxu1 %v721_v0  ;;  %s685_s6 = scalar_lea.vmem %s436_s28, 128  ;;  %p690_p5 = scmp.lt.s32.totalorder %s436_s28, %s436_s28 }
  0x56   :  { %p686_p4 = scmp.ne.s32.totalorder %s436_s28, %s685_s6  ;;  %p691_p6 = scmp.lt.s32.totalorder %s685_s6, %s685_s6 }
  0x58   :  { %507 = vmatpush3.bf16.msra.mxu0 %v572_v5  ;;  %527 = vmatpush3.bf16.msra.mxu1 %v580_v10  ;;  %p692_p7 = por %p691_p6, %p690_p5 }
  0x59   :  { %508 = vmatprep.subr.bf16.mxu0 %v721_v0  ;;  %528 = vmatprep.subr.bf16.mxu1 %v721_v0 }
  0x5a   :  { %p693_p8 = pnand %p692_p7, %p686_p4 }
  0x5c   :  { %509 = vmatpush3.bf16.msra.mxu0 %v573_v7  ;;  %529 = vmatpush3.bf16.msra.mxu1 %v581_v12 }
  0x5d   :  { %510 = vmatprep.subr.bf16.mxu0 %v721_v0  ;;  %530 = vmatprep.subr.bf16.mxu1 %v721_v0 }
  0x60   :  { %511 = vmatpush3.bf16.msra.mxu0 %v574_v9  ;;  %531 = vmatpush3.bf16.msra.mxu1 %v582_v14 }
  0x61   :  { %512 = vmatprep.subr.bf16.mxu0 %v721_v0  ;;  %532 = vmatprep.subr.bf16.mxu1 %v721_v0 }
  0x64   :  { %513 = vmatpush3.bf16.msra.mxu0 %v575_v11  ;;  %533 = vmatpush3.bf16.msra.mxu1 %v583_v16 }
  0x65   :  { %514 = vmatprep.subr.bf16.mxu0 %v721_v0  ;;  %534 = vmatprep.subr.bf16.mxu1 %v721_v0 }
  0x68   :  { %515 = vmatpush3.bf16.msra.mxu0 %v576_v13  ;;  %535 = vmatpush3.bf16.msra.mxu1 %v584_v17 }
  0x69   :  { %540 = vmatprep.subr.bf16.mxu0 %v721_v0 }
  0x6b   :  { %517 = vmatmul.mubr.bf16.vlgmr.msra.gmra.mrb[0].mxu0 %v81_v15 }
  0x6c   :  { %556 = vmatprep.mubr.msk.bf16.mxu0 %vm722_vm0, %v721_v0  ;;  %541 = vmatpush3.bf16.msra.mxu0 %v585_v18 }
  0x6d   :  { %542 = vmatprep.subr.bf16.mxu0 %v721_v0 }
  0x70   :  { %543 = vmatpush3.bf16.msra.mxu0 %v586_v19 }
  0x71   :  { %544 = vmatprep.subr.bf16.mxu0 %v721_v0 }
  0x74   :  { %545 = vmatpush3.bf16.msra.mxu0 %v587_v20 }
  0x75   :  { %546 = vmatprep.subr.bf16.mxu0 %v721_v0 }
  0x78   :  { %547 = vmatpush3.bf16.msra.mxu0 %v588_v21 }
  0x79   :  { %548 = vmatprep.subr.bf16.mxu0 %v721_v0 }
  0x7c   :  { %549 = vmatpush3.bf16.msra.mxu0 %v589_v22 }
  0x7d   :  { %550 = vmatprep.subr.bf16.mxu0 %v721_v0 }
  0x80   :  { %551 = vmatpush3.bf16.msra.mxu0 %v590_v23 }
  0x81   :  { %552 = vmatprep.subr.bf16.mxu0 %v721_v0 }
  0x84   :  { %553 = vmatpush3.bf16.msra.mxu0 %v591_v32 }
  0x85   :  { %554 = vmatprep.subr.bf16.mxu0 %v721_v0 }
  0x88   :  { %555 = vmatpush3.bf16.msra.mxu0 %v592_v33 }
 0x13e   :  { %v187_v25 = vpop.f32.mrb[0].mxu0 }
 0x13f   :  { %v188_v26 = vadd.f32 %v446_v24, %v187_v25  ;;  %v518_v27 = vpop.f32.mrb[1].mxu0 }
 0x140   :  { %v190_v28 = vpop.f32.mrb[2].mxu0 }
 0x141   :  { %v193_v29 = vmax.f32 %v188_v26, 0.0  ;;  %v519_v30 = vpop.f32.mrb[3].mxu0 }
 0x143   :  { %v194_v31 = vpack.c.bf16 %v193_v29, %v193_v29 }
 0x145   :  { %537 = vmatmul.mubr.bf16.vlgmr.msra.gmra.mrb[0].mxu1 %v194_v31 }
 0x218   :  { %v300_v35 = vpop.f32.mrb[0].mxu1 }
 0x219   :  { %v301_v36 = vadd.f32 %v455_v34, %v300_v35  ;;  %v538_v37 = vpop.f32.mrb[1].mxu1 }
 0x21a   :  { %v303_v38 = vpop.f32.mrb[2].mxu1 }
 0x21b   :  { %v306_v39 = vmax.f32 %v301_v36, 0.0  ;;  %v539_v40 = vpop.f32.mrb[3].mxu1 }
 0x21d   :  { %v307_v41 = vpack.c.bf16 %v306_v39, %v306_v39 }
 0x21f   :  { %557 = vmatmul.mubr.bf16.vlgmr.msra.gmra.mrb[4].mxu0 %v307_v41 }
 0x2f2   :  { %v413_v43 = vpop.f32.mrb[4].mxu0 }
 0x2f3   :  { %v414_v44 = vadd.f32 %v464_v42, %v413_v43  ;;  %v558_v45 = vpop.f32.mrb[5].mxu0 }
 0x2f4   :  { %v416_v46 = vpop.f32.mrb[6].mxu0 }
 0x2f5   :  { %419 = vmax.xlane.f32.xlu0 %v414_v44  ;;  %v559_v47 = vpop.f32.mrb[7].mxu0 }
 0x382   :  { %v420_v48 = vpop.xlane.xlu0 %419 }
 0x383   :  { %v421_v49 = vsub.f32 %v414_v44, %v420_v48 }
 0x385   :  { %v422_v50 = vmul.f32 1.442695, %v421_v49 }
 0x387   :  { %593 = vpow2.f32 %v422_v50 }
 0x391   :  { %v594_v51 = vpop.eup %593 }
 0x392   :  { %424 = vadd.xlane.f32.xlu0 %v594_v51 }
 0x41f   :  { %v425_v52 = vpop.xlane.xlu0 %424 }
 0x420   :  { %595 = vrcp.f32 %v425_v52 }
 0x42a   :  { %v596_v53 = vpop.eup %595 }
 0x42b   :  { %v427_v54 = vmul.f32 %v596_v53, %v594_v51 }
 0x42d   :  { %428 = vst [vmem:[#allocation10] sm:$0xff] %v427_v54 }
 0x42e   :  { %696 = shalt.err (!%p693_p8)
}
 0x42f   :  { %s697_s8 = scalar_lea.hbm %s879_s7, 128 }
 0x430   :  { %p698_p9 = scmp.ne.s32.totalorder %s879_s7, %s697_s8  ;;  %p701_p10 = scmp.lt.u32.totalorder %s697_s8, %s879_s7 }
 0x432   :  { %p703_p11 = pnand %p701_p10, %p698_p9 }
 0x434   :  { %706 = shalt.err (!%p703_p11)
}
 0x435   :  { %438 = dma.vmem_to_hbm [thread:$0]  %s436_s28, 128, %s879_s7, [#allocation4]  }
 0x436   :  { %713 = dma.done.wait [#allocation4], 128  }
 0x437   :  { %714 = vsyncadd [#allocation4], 4294967168 }
 0x438   :  { %442 = vsyncpa [#allocation3], 1 }
 0x439   :  { %443 = vsyncpa [#allocation6], 1 }
 0x43a   :  { %444 = vsyncpa [#allocation9], 1 }
 0x43b   :  { %445 = vsyncpa [#allocation4], 1 }

</bundles_post_ra>
